<compile_context>
chip_gen: v5e
topology: v5e:2x2
jax: 0.10.0
libtpu: 0.0.40
codegen_flags: <defaults>
</compile_context>

<pallas_src>
import functools

import jax
import jax.numpy as jnp
from jax.experimental import pallas as pl
from jax.experimental.pallas import tpu as pltpu

LANES = 128
SUBLANES = 8
MAX_TILE_ROWS = 2048  # 2048 x 128 f32 = 1 MiB per input block (sweepable 1024-4096)


def _focal_bce_from_logits(x, t, gamma, delta):
    """Elementwise unified-focal BCE-with-logits term (f32 in, f32 out)."""
    # single exp, reused for the stable BCE log-term AND sigmoid
    e = jnp.exp(-jnp.abs(x))
    ce = jnp.maximum(x, 0.0) - x * t + jnp.log1p(e)
    inv = 1.0 / (1.0 + e)
    p = jnp.where(x >= 0.0, inv, e * inv)            # == sigmoid(x), no 2nd exp
    p_t = p * t + (1.0 - p) * (1.0 - t)
    alpha_t = t * delta + (1.0 - t) * (1.0 - delta)
    omp = 1.0 - p_t
    g = float(gamma)
    if g == 2.0:
        focal = omp * omp                             # avoid pow -> exp(log), NaN-safe
    elif g.is_integer() and 0.0 <= g <= 8.0:
        focal = jnp.ones_like(omp)
        for _ in range(int(g)):
            focal = focal * omp
    else:
        focal = omp ** g
    return alpha_t * focal * ce


def _ufl_sum_kernel(pred_ref, targ_ref, out_ref, acc_ref, *,
                    gamma, delta, n_split, tiles_per_split,
                    tile_rows, last_valid_rows):
    i = pl.program_id(1)          # "arbitrary" (reduction) axis

    @pl.when(i == 0)
    def _init():
        acc_ref[...] = jnp.zeros_like(acc_ref)

    x = pred_ref[...].astype(jnp.float32)
    t = targ_ref[...].astype(jnp.float32)
    loss = _focal_bce_from_logits(x, t, gamma, delta)

    def _accumulate(vals):
        # (tile_rows,128) -> (tile_rows//8, 8, 128); leading-axis sum is pure
        # elementwise VPU vreg adds into the (8,128) accumulator (no per-step
        # XLU cross-lane reduce, no SMEM scalar RMW on the critical path).
        acc_ref[...] += vals.reshape(tile_rows // SUBLANES, SUBLANES, LANES).sum(axis=0)

    if last_valid_rows == tile_rows:
        # every tile fully valid; no masking anywhere (trace-time decision)
        _accumulate(loss)
    else:
        s = pl.program_id(0)
        is_last = jnp.logical_and(s == n_split - 1, i == tiles_per_split - 1)

        @pl.when(jnp.logical_not(is_last))
        def _full():
            _accumulate(loss)

        @pl.when(is_last)
        def _partial():
            rows = jax.lax.broadcasted_iota(jnp.int32, loss.shape, 0)
            _accumulate(jnp.where(rows < last_valid_rows, loss, 0.0))

    @pl.when(i == tiles_per_split - 1)
    def _finalize():
        out_ref[0, 0] = jnp.sum(acc_ref[...])   # single cross-lane reduce


def unified_focal_loss(pred, target, *, gamma=2.0, delta=0.6, reduction="mean"):
    """Pallas implementation of UnifiedFocalLoss.forward (weight=None)."""
    # TODO(synk): reduction='none' and a per-element `weight` tensor are not
    # implemented (module defaults only); both are a trivial epilogue change.
    if reduction not in ("mean", "sum"):
        raise NotImplementedError("only reduction='mean'/'sum' implemented")

    n = pred.size
    flat_p = pred.reshape(-1)      # metadata-only for contiguous inputs
    flat_t = target.reshape(-1)

    # main slab: a multiple of 8*128 elements, processed by the kernel in its
    # native dtype (cast happens in-kernel).  The < 1024-element remainder is
    # summed in plain JAX -- negligible, avoids any wrapper pad/cast copy.
    main_rows = (n // (SUBLANES * LANES)) * SUBLANES
    main_elems = main_rows * LANES

    if main_elems < n:
        tail_p = flat_p[main_elems:].astype(jnp.float32)
        tail_t = flat_t[main_elems:].astype(jnp.float32)
        tail_sum = jnp.sum(_focal_bce_from_logits(tail_p, tail_t,
                                                  float(gamma), float(delta)))
        # only in this (n % 1024 != 0) case does slicing force one copy
        main_p = flat_p[:main_elems].reshape(main_rows, LANES)
        main_t = flat_t[:main_elems].reshape(main_rows, LANES)
    else:
        tail_sum = jnp.float32(0.0)
        main_p = flat_p.reshape(main_rows, LANES)
        main_t = flat_t.reshape(main_rows, LANES)

    if main_rows == 0:
        total = tail_sum
    else:
        tile_rows = min(MAX_TILE_ROWS, main_rows)
        n_tiles = pl.cdiv(main_rows, tile_rows)
        # split the tile loop across 2 cores when it divides evenly (v7x
        # megacore); harmless size-1 grid axis on single-TC v5e/v6e.
        n_split = 2 if (n_tiles >= 2 and n_tiles % 2 == 0) else 1
        tiles_per_split = n_tiles // n_split
        last_valid_rows = main_rows - (n_tiles - 1) * tile_rows

        kernel = functools.partial(
            _ufl_sum_kernel,
            gamma=float(gamma), delta=float(delta),
            n_split=n_split, tiles_per_split=tiles_per_split,
            tile_rows=tile_rows, last_valid_rows=last_valid_rows,
        )

        idx_map = lambda s, i, _tps=tiles_per_split: (s * _tps + i, 0)

        partial_sums = pl.pallas_call(
            kernel,
            out_shape=jax.ShapeDtypeStruct((n_split, 1), jnp.float32),
            grid=(n_split, tiles_per_split),
            in_specs=[
                pl.BlockSpec((tile_rows, LANES), idx_map),
                pl.BlockSpec((tile_rows, LANES), idx_map),
            ],
            out_specs=pl.BlockSpec((1, 1), lambda s, i: (s, 0),
                                   memory_space=pltpu.SMEM),
            scratch_shapes=[pltpu.VMEM((SUBLANES, LANES), jnp.float32)],
            compiler_params=pltpu.CompilerParams(
                dimension_semantics=("parallel", "arbitrary")),
        )(main_p, main_t)

        total = jnp.sum(partial_sums) + tail_sum

    if reduction == "sum":
        return total
    return total / jnp.float32(n)


def _reference(pred, target, gamma=2.0, delta=0.6):
    x = pred.astype(jnp.float32)
    t = target.astype(jnp.float32)
    ce = jnp.maximum(x, 0.0) - x * t + jnp.log1p(jnp.exp(-jnp.abs(x)))
    p = jax.nn.sigmoid(x)
    p_t = p * t + (1 - p) * (1 - t)
    alpha_t = t * delta + (1 - t) * (1 - delta)
    loss = alpha_t * (1 - p_t) ** gamma * ce
    return loss.mean()


if __name__ == "__main__":
    key = jax.random.PRNGKey(0)

    shapes = [
        (2, 4, 16, 16),     # small NCHW seg-head shape (single-tile path)
        (2, 4, 256, 129),   # multi-tile + 2-way split + partial-last-tile mask
        (2, 3, 17, 23),     # exercises the <1024-element plain-JAX tail path
    ]
    for shape in shapes:
        k1, k2, key = jax.random.split(key, 3)
        pred = jax.random.normal(k1, shape, dtype=jnp.float32) * 2.0
        target = (jax.random.uniform(k2, shape) > 0.5).astype(jnp.float32)

        out = jax.block_until_ready(unified_focal_loss(pred, target))
        ref = jax.block_until_ready(_reference(pred, target))
        assert jnp.allclose(out, ref, rtol=1e-4, atol=1e-6), (shape, out, ref)

    print("KERNEL_OK")
</pallas_src>

<mosaic_0001>
module attributes {stable_mosaic.version = 11 : i64} {
  func.func @_ufl_sum_kernel(%arg0: i32, %arg1: i32, %arg2: memref<16x128xf32, #tpu.memory_space<vmem>>, %arg3: memref<16x128xf32, #tpu.memory_space<vmem>>, %arg4: memref<1x1xf32, #tpu.memory_space<smem>>, %arg5: memref<8x128xf32, #tpu.memory_space<vmem>>) attributes {dimension_semantics = [#tpu.dimension_semantics<parallel>, #tpu.dimension_semantics<arbitrary>], iteration_bounds = array<i64: 1, 1>, scalar_prefetch = 0 : i64, scratch_operands = 1 : i64, tpu.core_type = #tpu.core_type<tc>, window_params = [{transform_indices = @transform_0, window_bounds = array<i64: 16, 128>}, {transform_indices = @transform_1, window_bounds = array<i64: 16, 128>}, {transform_indices = @transform_2, window_bounds = array<i64: 1, 1>}]} {
    %c0_i32 = arith.constant 0 : i32
    %0 = arith.cmpi eq, %arg1, %c0_i32 : i32
    %1 = arith.extui %0 : i1 to i32
    %c0_i32_0 = arith.constant 0 : i32
    %2 = arith.cmpi ne, %1, %c0_i32_0 : i32
    scf.if %2 {
      %cst_21 = arith.constant 0.000000e+00 : f32
      %50 = vector.broadcast %cst_21 : f32 to vector<8x128xf32>
      %c0_22 = arith.constant 0 : index
      %c0_23 = arith.constant 0 : index
      %51 = vector.load %arg5[%c0_22, %c0_23] : memref<8x128xf32, #tpu.memory_space<vmem>>, vector<8x128xf32>
      tpu.vector_store %arg5[%c0_22, %c0_23], %50 {strides = array<i32>} : memref<8x128xf32, #tpu.memory_space<vmem>>, vector<8x128xf32>,
    } else {
    }
    %c0 = arith.constant 0 : index
    %c0_1 = arith.constant 0 : index
    %3 = vector.load %arg2[%c0, %c0_1] : memref<16x128xf32, #tpu.memory_space<vmem>>, vector<16x128xf32>
    %c0_2 = arith.constant 0 : index
    %c0_3 = arith.constant 0 : index
    %4 = vector.load %arg3[%c0_2, %c0_3] : memref<16x128xf32, #tpu.memory_space<vmem>>, vector<16x128xf32>
    %5 = math.absf %3 : vector<16x128xf32>
    %cst = arith.constant 0.000000e+00 : f32
    %6 = vector.broadcast %cst : f32 to vector<16x128xf32>
    %7 = arith.subf %6, %5 : vector<16x128xf32>
    %8 = math.exp %7 : vector<16x128xf32>
    %cst_4 = arith.constant 0.000000e+00 : f32
    %9 = vector.broadcast %cst_4 : f32 to vector<16x128xf32>
    %10 = arith.maximumf %3, %9 : vector<16x128xf32>
    %11 = arith.mulf %3, %4 : vector<16x128xf32>
    %12 = arith.subf %10, %11 : vector<16x128xf32>
    %13 = math.log1p %8 : vector<16x128xf32>
    %14 = arith.addf %12, %13 : vector<16x128xf32>
    %cst_5 = arith.constant 1.000000e+00 : f32
    %15 = vector.broadcast %cst_5 : f32 to vector<16x128xf32>
    %16 = arith.addf %15, %8 : vector<16x128xf32>
    %cst_6 = arith.constant 1.000000e+00 : f32
    %17 = vector.broadcast %cst_6 : f32 to vector<16x128xf32>
    %18 = arith.divf %17, %16 : vector<16x128xf32>
    %cst_7 = arith.constant 0.000000e+00 : f32
    %19 = vector.broadcast %cst_7 : f32 to vector<16x128xf32>
    %20 = arith.cmpf oge, %3, %19 : vector<16x128xf32>
    %21 = arith.mulf %8, %18 : vector<16x128xf32>
    %22 = arith.select %20, %18, %21 : vector<16x128xi1>, vector<16x128xf32>
    %23 = arith.mulf %22, %4 : vector<16x128xf32>
    %cst_8 = arith.constant 1.000000e+00 : f32
    %24 = vector.broadcast %cst_8 : f32 to vector<16x128xf32>
    %25 = arith.subf %24, %22 : vector<16x128xf32>
    %cst_9 = arith.constant 1.000000e+00 : f32
    %26 = vector.broadcast %cst_9 : f32 to vector<16x128xf32>
    %27 = arith.subf %26, %4 : vector<16x128xf32>
    %28 = arith.mulf %25, %27 : vector<16x128xf32>
    %29 = arith.addf %23, %28 : vector<16x128xf32>
    %cst_10 = arith.constant 6.000000e-01 : f32
    %30 = vector.broadcast %cst_10 : f32 to vector<16x128xf32>
    %31 = arith.mulf %4, %30 : vector<16x128xf32>
    %cst_11 = arith.constant 1.000000e+00 : f32
    %32 = vector.broadcast %cst_11 : f32 to vector<16x128xf32>
    %33 = arith.subf %32, %4 : vector<16x128xf32>
    %cst_12 = arith.constant 4.000000e-01 : f32
    %34 = vector.broadcast %cst_12 : f32 to vector<16x128xf32>
    %35 = arith.mulf %33, %34 : vector<16x128xf32>
    %36 = arith.addf %31, %35 : vector<16x128xf32>
    %cst_13 = arith.constant 1.000000e+00 : f32
    %37 = vector.broadcast %cst_13 : f32 to vector<16x128xf32>
    %38 = arith.subf %37, %29 : vector<16x128xf32>
    %39 = arith.mulf %38, %38 : vector<16x128xf32>
    %40 = arith.mulf %36, %39 : vector<16x128xf32>
    %41 = arith.mulf %40, %14 : vector<16x128xf32>
    %c0_14 = arith.constant 0 : index
    %c0_15 = arith.constant 0 : index
    %42 = vector.load %arg5[%c0_14, %c0_15] : memref<8x128xf32, #tpu.memory_space<vmem>>, vector<8x128xf32>
    %43 = vector.shape_cast %41 : vector<16x128xf32> to vector<2x8x128xf32>
    %cst_16 = arith.constant dense<0.000000e+00> : vector<8x128xf32>
    %44 = vector.multi_reduction <add>, %43, %cst_16 [0] : vector<2x8x128xf32> to vector<8x128xf32>
    %45 = arith.addf %42, %44 : vector<8x128xf32>
    %c0_17 = arith.constant 0 : index
    %c0_18 = arith.constant 0 : index
    %46 = vector.load %arg5[%c0_17, %c0_18] : memref<8x128xf32, #tpu.memory_space<vmem>>, vector<8x128xf32>
    tpu.vector_store %arg5[%c0_17, %c0_18], %45 {strides = array<i32>} : memref<8x128xf32, #tpu.memory_space<vmem>>, vector<8x128xf32>,
    %c0_i32_19 = arith.constant 0 : i32
    %47 = arith.cmpi eq, %arg1, %c0_i32_19 : i32
    %48 = arith.extui %47 : i1 to i32
    %c0_i32_20 = arith.constant 0 : i32
    %49 = arith.cmpi ne, %48, %c0_i32_20 : i32
    scf.if %49 {
      %c0_21 = arith.constant 0 : index
      %c0_22 = arith.constant 0 : index
      %50 = vector.load %arg5[%c0_21, %c0_22] : memref<8x128xf32, #tpu.memory_space<vmem>>, vector<8x128xf32>
      %51 = vector.shape_cast %50 : vector<8x128xf32> to vector<1x8x128xf32>
      %cst_23 = arith.constant dense<0.000000e+00> : vector<1xf32>
      %52 = vector.multi_reduction <add>, %51, %cst_23 [1, 2] : vector<1x8x128xf32> to vector<1xf32>
      %53 = vector.shape_cast %52 : vector<1xf32> to vector<1x1x1xf32>
      %54 = vector.extract %53[0, 0, 0] : f32 from vector<1x1x1xf32>
      %c0_24 = arith.constant 0 : index
      %c0_25 = arith.constant 0 : index
      %55 = memref.load %arg4[%c0_24, %c0_25] : memref<1x1xf32, #tpu.memory_space<smem>>
      memref.store %54, %arg4[%c0_24, %c0_25] : memref<1x1xf32, #tpu.memory_space<smem>>
    } else {
    }
    return
  }
  func.func @transform_0(%arg0: i32, %arg1: i32) -> (i32, i32) {
    %c1_i32 = arith.constant 1 : i32
    %0 = arith.muli %arg0, %c1_i32 : i32
    %1 = arith.addi %0, %arg1 : i32
    %c0_i32 = arith.constant 0 : i32
    %c0_i32_0 = arith.constant 0 : i32
    return %1, %c0_i32 : i32, i32
  }
  func.func @transform_1(%arg0: i32, %arg1: i32) -> (i32, i32) {
    %c1_i32 = arith.constant 1 : i32
    %0 = arith.muli %arg0, %c1_i32 : i32
    %1 = arith.addi %0, %arg1 : i32
    %c0_i32 = arith.constant 0 : i32
    %c0_i32_0 = arith.constant 0 : i32
    return %1, %c0_i32 : i32, i32
  }
  func.func @transform_2(%arg0: i32, %arg1: i32) -> (i32, i32) {
    %c0_i32 = arith.constant 0 : i32
    %c0_i32_0 = arith.constant 0 : i32
    return %arg0, %c0_i32 : i32, i32
  }
}

</mosaic_0001>

<bundles_post_ra>
// kernel: tpu_custom_call.1
= control target key start
LH: loop header
LB: loop body
LE: loop exit
PB: predicated region body
PF: predicated region fallthrough
CT: control target
= control target key end

     0   :  { %7 = vsyncpa [#allocation4], 0  ;;  %s361_s0 = inlined_call_operand.hbm [shape: f32[16,128], index: 0, kind: input, shape index: {}]   ;;  %s362_s1 = inlined_call_operand.hbm [shape: f32[16,128], index: 1, kind: input, shape index: {}]   ;;  %s363_s2 = inlined_call_operand.hbm [shape: f32[1,1], index: 2, kind: output, shape index: {}]  }
   0x1   :  { %8 = vsyncpa [#allocation7], 0 }
   0x2   :  { %9 = vsyncpa [#allocation5], 0  ;;  %s18_s11 = sshll.u32 %s361_s0, 4  ;;  %s282_s12 = smov [#allocation3]   ;;  %s19_s11 = int_to_ptr.hbm [resolvable:$true] %s18_s11 }
   0x3   :  { %s20_s13 = sshll.u32 %s282_s12, 4  ;;  %s35_s16 = sshll.u32 %s362_s1, 4  ;;  %s21_s13 = int_to_ptr.vmem [resolvable:$true] %s20_s13  ;;  %s36_s16 = int_to_ptr.hbm [resolvable:$true] %s35_s16 }
   0x4   :  { %s283_s17 = smov 128   ;;  %s284_s18 = smov 8  }
   0x5   :  { %26 = dma.hbm_to_vmem [thread:$0]  %s19_s11, 256, %s21_s13, [#allocation4], %s283_s17, %s283_s17, %s284_s18  }
   0x6   :  { %s285_s19 = smov [#allocation6]  }
   0x7   :  { %s37_s20 = sshll.u32 %s285_s19, 4  ;;  %s38_s20 = int_to_ptr.vmem [resolvable:$true] %s37_s20 }
   0x8   :  { %43 = dma.hbm_to_vmem [thread:$0]  %s36_s16, 256, %s38_s20, [#allocation7], %s283_s17, %s283_s17, %s284_s18  }
   0x9   :  { %276 = dma.done.wait [#allocation4], 256  }
   0xa   :  { %277 = vsyncadd [#allocation4], 4294967040 }
   0xb   :  { %278 = dma.done.wait [#allocation7], 256  }
   0xc   :  { %279 = vsyncadd [#allocation7], 4294967040  ;;  %v308_v0 = vld [vmem:[#allocation3] sm:$0xff]  ;;  %v310_v1 = vld [vmem:[#allocation3 + $0x8] sm:$0xff]  ;;  %s185_s21 = sshll.u32 %s363_s2, 4  ;;  %s286_s23 = smov [#allocation8]   ;;  %s186_s21 = int_to_ptr.hbm [resolvable:$true] %s185_s21 }
   0xd   :  { %v65_v2 = vand.u32 2147483647, %v308_v0  ;;  %v66_v3 = vand.u32 2147483647, %v310_v1  ;;  %v63_v30 = vld [vmem:[#allocation6] sm:$0xff]  ;;  %v64_v33 = vld [vmem:[#allocation6 + $0x8] sm:$0xff] }
   0xe   :  { %v73_v34 = vmax.f32 %v308_v0, 0.0  ;;  %v74_v35 = vmax.f32 %v310_v1, 0.0  ;;  %v75_v36 = vmul.f32 %v63_v30, %v308_v0  ;;  %v76_v38 = vmul.f32 %v64_v33, %v310_v1 }
   0xf   :  { %v67_v4 = vsub.f32 0.0, %v65_v2  ;;  %v68_v5 = vsub.f32 0.0, %v66_v3  ;;  %vm131_vm8 = vcmp.ge.f32.partialorder %v308_v0, 0.0  ;;  %vm132_vm9 = vcmp.ge.f32.partialorder %v310_v1, 0.0 }
  0x10   :  { %v141_v48 = vsub.f32 1.0, %v63_v30  ;;  %v142_v52 = vsub.f32 1.0, %v64_v33  ;;  %v147_v53 = vmul.f32 0.6, %v63_v30 }
  0x11   :  { %v69_v6 = vmul.f32 1.442695, %v67_v4  ;;  %v71_v7 = vmul.f32 1.442695, %v68_v5  ;;  %v148_v4 = vmul.f32 0.6, %v64_v33 }
  0x12   :  { %v149_v57 = vmul.f32 0.4, %v141_v48  ;;  %v150_v5 = vmul.f32 0.4, %v142_v52 }
  0x13   :  { %204 = vpow2.f32 %v69_v6  ;;  %v77_v6 = vsub.f32 %v73_v34, %v75_v36 }
  0x14   :  { %206 = vpow2.f32 %v71_v7 }
  0x19   :  { %v314_v8 = vpop.eup %204 }
  0x1a   :  { %v316_v9 = vpop.eup %206  ;;  %v79_v10 = vadd.f32 1.0, %v314_v8  ;;  %v82_v23 = vmul.f32 -0.5, %v314_v8  ;;  %v85_v45 = vand.u32 2147483647, %v314_v8 }
  0x1b   :  { %v88_v11 = vadd.f32 1.0, %v316_v9  ;;  %v91_v31 = vmul.f32 -0.5, %v316_v9  ;;  %v94_v50 = vand.u32 2147483647, %v316_v9 }
  0x1c   :  { %208 = vrcp.f32 %v79_v10  ;;  %vm106_vm0 = vweird.f32 %v79_v10  ;;  %v112_v15 = vand.u32 2147483648, %v79_v10  ;;  %v110_v18 = vand.u32 2147483647, %v79_v10 }
  0x1d   :  { %210 = vrcp.f32 %v88_v11  ;;  %v127_v19 = vand.u32 2147483648, %v88_v11  ;;  %vm121_vm2 = vweird.f32 %v88_v11  ;;  %v125_v21 = vand.u32 2147483647, %v88_v11 }
  0x1e   :  { %212 = vlog2.f32 %v79_v10  ;;  %v113_v25 = vor.u32 1.1754944e-38, %v112_v15  ;;  %vm111_vm5 = vcmp.eq.f32.partialorder %v110_v18, 8.507059e+37  ;;  %v83_v41 = vadd.f32 1.0, %v82_v23 }
  0x1f   :  { %214 = vlog2.f32 %v88_v11  ;;  %v128_v29 = vor.u32 1.1754944e-38, %v127_v19  ;;  %vm126_vm7 = vcmp.eq.f32.partialorder %v125_v21, 8.507059e+37  ;;  %v92_v46 = vadd.f32 1.0, %v91_v31 }
  0x20   :  { %v84_v59 = vmul.f32 %v314_v8, %v83_v41  ;;  %vm345_vm10 = vcmp.lt.f32.partialorder %v85_v45, 0.0004427343  ;;  %vm350_vm11 = vcmp.lt.f32.partialorder %v94_v50, 0.0004427343 }
  0x21   :  { %v93_v0 = vmul.f32 %v316_v9, %v92_v46 }
  0x22   :  { %v209_v12 = vpop.eup %208 }
  0x23   :  { %v211_v13 = vpop.eup %210  ;;  %v102_v14 = vmul.f32 %v209_v12, %v79_v10  ;;  %vm107_vm1 = vweird.f32 %v209_v12 }
  0x24   :  { %v117_v16 = vmul.f32 %v211_v13, %v88_v11  ;;  %vm122_vm3 = vweird.f32 %v211_v13  ;;  %vm321_vm4 = vmor %vm106_vm0, %vm107_vm1  ;;  %v213_v44 = vpop.eup %212 }
  0x25   :  { %v103_v17 = vsub.f32 1.0, %v102_v14  ;;  %vm325_vm6 = vmor %vm121_vm2, %vm122_vm3  ;;  %v215_v49 = vpop.eup %214  ;;  %v81_v58 = vmul.f32 0.6931472, %v213_v44  ;;  %v152_v14 = vadd.f32 %v150_v5, %v148_v4 }
  0x26   :  { %v118_v20 = vsub.f32 1.0, %v117_v16  ;;  %v90_v63 = vmul.f32 0.6931472, %v215_v49 }
  0x27   :  { %v104_v22 = vmul.f32 %v209_v12, %v103_v17  ;;  %v87_v10 = vsel %vm345_vm10, %v84_v59, %v81_v58 }
  0x28   :  { %v119_v26 = vmul.f32 %v211_v13, %v118_v20  ;;  %v97_v16 = vadd.f32 %v87_v10, %v77_v6 }
  0x29   :  { %v105_v27 = vadd.f32 %v209_v12, %v104_v22 }
  0x2a   :  { %v120_v32 = vadd.f32 %v211_v13, %v119_v26 }
  0x2b   :  { %v109_v37 = vsel %vm321_vm4, %v209_v12, %v105_v27  ;;  %v96_v12 = vsel %vm350_vm11, %v93_v0, %v90_v63 }
  0x2c   :  { %v114_v39 = vsel %vm111_vm5, %v113_v25, %v109_v37  ;;  %v124_v40 = vsel %vm325_vm6, %v211_v13, %v120_v32  ;;  %v151_v13 = vadd.f32 %v149_v57, %v147_v53 }
  0x2d   :  { %v129_v42 = vsel %vm126_vm7, %v128_v29, %v124_v40  ;;  %v133_v43 = vmul.f32 %v314_v8, %v114_v39  ;;  %v78_v8 = vsub.f32 %v74_v35, %v76_v38 }
  0x2e   :  { %v134_v47 = vmul.f32 %v316_v9, %v129_v42 }
  0x2f   :  { %v135_v51 = vsel %vm131_vm8, %v114_v39, %v133_v43  ;;  %v98_v18 = vadd.f32 %v96_v12, %v78_v8 }
  0x30   :  { %v136_v54 = vsel %vm132_vm9, %v129_v42, %v134_v47  ;;  %v137_v55 = vmul.f32 %v135_v51, %v63_v30  ;;  %v139_v56 = vsub.f32 1.0, %v135_v51 }
  0x31   :  { %v138_v60 = vmul.f32 %v136_v54, %v64_v33  ;;  %v140_v61 = vsub.f32 1.0, %v136_v54 }
  0x32   :  { %v143_v1 = vmul.f32 %v141_v48, %v139_v56 }
  0x33   :  { %v144_v3 = vmul.f32 %v142_v52, %v140_v61 }
  0x34   :  { %v145_v7 = vadd.f32 %v143_v1, %v137_v55 }
  0x35   :  { %v146_v11 = vadd.f32 %v144_v3, %v138_v60 }
  0x36   :  { %v153_v9 = vsub.f32 1.0, %v145_v7 }
  0x37   :  { %v154_v15 = vsub.f32 1.0, %v146_v11 }
  0x38   :  { %v155_v17 = vmul.f32 %v153_v9, %v153_v9 }
  0x39   :  { %v156_v19 = vmul.f32 %v154_v15, %v154_v15 }
  0x3a   :  { %v157_v20 = vmul.f32 %v155_v17, %v151_v13 }
  0x3b   :  { %v158_v21 = vmul.f32 %v156_v19, %v152_v14 }
  0x3c   :  { %v159_v22 = vmul.f32 %v157_v20, %v97_v16 }
  0x3d   :  { %v160_v23 = vmul.f32 %v158_v21, %v98_v18 }
  0x3f   :  { %v162_v24 = vadd.f32 %v160_v23, %v159_v22 }
  0x41   :  { %169 = vadd.xlane.f32.xlu0 %v162_v24 }
  0xb4   :  { %v170_v25 = vpop.xlane.xlu0 %169 }
  0xb5   :  { %v171_v26 = vrot.slane %v170_v25, 4 }
  0xb7   :  { %v172_v27 = vadd.f32 %v171_v26, %v170_v25 }
  0xb9   :  { %v173_v28 = vrot.slane %v172_v27, 2 }
  0xbb   :  { %v174_v29 = vadd.f32 %v173_v28, %v172_v27 }
  0xbd   :  { %v175_v30 = vrot.slane %v174_v29, 1 }
  0xbf   :  { %v176_v31 = vadd.f32 %v175_v30, %v174_v29 }
  0xc1   :  { %197 = vpush %v176_v31 }
  0xf2   :  { %s198_s22 = spop %197 }
  0xf3   :  { %179 = sst [smem:[#allocation8]] %s198_s22 }
  0xf4   :  { %188 = dma.smem_to_hbm %s286_s23, 16, %s186_s21, [#allocation5]  }
  0xf5   :  { %280 = dma.done.wait [#allocation5], 16  }
  0xf6   :  { %281 = vsyncadd [#allocation5], 4294967280 }
  0xf7   :  { %193 = sfence }
  0xf8   :  { %194 = vsyncpa [#allocation4], 1 }
  0xf9   :  { %195 = vsyncpa [#allocation7], 1 }
  0xfa   :  { %196 = vsyncpa [#allocation5], 1 }

</bundles_post_ra>
